<compile_context>
chip_gen: v5e
topology: v5e:2x2
jax: 0.10.0
libtpu: 0.0.40
codegen_flags: <defaults>
</compile_context>

<pallas_src>
import functools
import math

import jax
import jax.numpy as jnp
from jax import lax
from jax.experimental import pallas as pl
from jax.experimental.pallas import tpu as pltpu


def _mh_kernel(*refs, has_mask, n_splits, dk, compute_dtype):
    if has_mask:
        (q_ref, k_ref, v_ref, mask_ref,
         wq_ref, wk_ref, wv_ref, wo_ref, o_ref,
         kh_scr, vh_scr, ctx_scr) = refs
    else:
        (q_ref, k_ref, v_ref,
         wq_ref, wk_ref, wv_ref, wo_ref, o_ref,
         kh_scr, vh_scr, ctx_scr) = refs
        mask_ref = None

    qt = pl.program_id(1)

    # --- K/V projections: once per batch element, cached for all query tiles.
    # Full-width (S,H)@(H,H) matmuls (N = H) keep the 256-wide MXUs filled.
    @pl.when(qt == 0)
    def _():
        k = k_ref[0].astype(compute_dtype)        # (S, H)
        v = v_ref[0].astype(compute_dtype)        # (S, H)
        kh_scr[...] = jnp.dot(k, wk_ref[...],
                              preferred_element_type=jnp.float32
                              ).astype(kh_scr.dtype)
        vh_scr[...] = jnp.dot(v, wv_ref[...],
                              preferred_element_type=jnp.float32
                              ).astype(vh_scr.dtype)

    # --- Q projection for this query tile (scale already folded into wq).
    q = q_ref[0].astype(compute_dtype)            # (tq, H)
    qh_all = jnp.dot(q, wq_ref[...],
                     preferred_element_type=jnp.float32
                     ).astype(compute_dtype)      # (tq, H)

    if has_mask:
        mask = mask_ref[0]                        # (tq, S) bool

    # --- Per-head attention (static unrolled loop; n_splits is small).
    # Heads are written into a concatenated (tq, H) context scratch so the
    # output projection is a single full-depth (tq,H)@(H,H) matmul.
    for h in range(n_splits):
        lo = h * dk
        qh = qh_all[:, lo:lo + dk]                # (tq, dk)
        kh = kh_scr[:, lo:lo + dk]                # (S, dk)
        vh = vh_scr[:, lo:lo + dk]                # (S, dk)

        # scores = qh @ kh^T (contract dim 1 with dim 1; no materialized K^T).
        s = lax.dot_general(qh, kh, (((1,), (1,)), ((), ())),
                            preferred_element_type=jnp.float32)   # (tq, S)
        if has_mask:
            s = jnp.where(mask, -jnp.inf, s)      # masked_fill_; scale in wq

        m = jnp.max(s, axis=-1, keepdims=True)
        e = jnp.exp(s - m)
        denom = jnp.sum(e, axis=-1, keepdims=True)
        p = (e * pl.reciprocal(denom, approx=True)).astype(compute_dtype)

        head = jnp.dot(p, vh, preferred_element_type=jnp.float32)  # (tq, dk)
        ctx_scr[:, lo:lo + dk] = head.astype(ctx_scr.dtype)

    # --- Single full-width output projection.
    out = jnp.dot(ctx_scr[...], wo_ref[...],
                  preferred_element_type=jnp.float32)              # (tq, H)
    o_ref[0] = out.astype(o_ref.dtype)


def _vmem_budget_bytes(S, H, tq, in_itemsize, cd_itemsize, has_mask):
    est = 0
    est += 2 * tq * H * in_itemsize            # Q block (x2 pipeline buffers)
    est += 2 * 2 * S * H * in_itemsize         # K, V blocks
    if has_mask:
        est += 2 * tq * S                      # bool mask block
    est += 2 * 4 * H * H * cd_itemsize         # 4 resident weights (conservative x2)
    est += 2 * tq * H * in_itemsize            # output block
    est += 2 * S * H * cd_itemsize             # kh / vh scratch
    est += tq * H * cd_itemsize                # ctx scratch
    est += 4 * tq * S * 4 + 3 * tq * H * 4     # f32 score/exp/proj intermediates
    return est


def multihead_forward(Q, K, V, Wq, Wk, Wv, Wo, n_splits, mask=None, tq=None,
                      use_bf16_compute=False):
    """Pallas implementation of MultiHead.forward. Q, K, V: (B, S, H)."""
    B, S, H = Q.shape
    assert H % n_splits == 0
    dk = H // n_splits

    if tq is None:
        # 256 fills v6e/v7x MXUs; on v5e (128-wide MXU) 128 is enough — keep it
        # overridable.  TODO(synk): flash-style S-tiling for very long S on v7x.
        tq = S if S <= 256 else 256
    assert S % tq == 0
    nq = S // tq

    compute_dtype = jnp.bfloat16 if use_bf16_compute else Q.dtype
    scale = 1.0 / math.sqrt(dk)

    # Host-side weight prep: transpose once, fold the softmax scale into the Q
    # projection weight, cast to the compute dtype.  Full (H, H) slabs with a
    # constant index_map => DMA'd once, resident in VMEM for the whole call.
    WqT = (Wq.T * scale).astype(compute_dtype)
    WkT = Wk.T.astype(compute_dtype)
    WvT = Wv.T.astype(compute_dtype)
    WoT = Wo.T.astype(compute_dtype)

    q_spec = pl.BlockSpec((1, tq, H), lambda b, qt: (b, qt, 0))
    kv_spec = pl.BlockSpec((1, S, H), lambda b, qt: (b, 0, 0))     # per-batch resident
    w_spec = pl.BlockSpec((H, H), lambda b, qt: (0, 0))            # resident weights
    o_spec = pl.BlockSpec((1, tq, H), lambda b, qt: (b, qt, 0))

    has_mask = mask is not None
    in_specs = [q_spec, kv_spec, kv_spec]
    inputs = [Q, K, V]
    if has_mask:
        in_specs.append(pl.BlockSpec((1, tq, S), lambda b, qt: (b, qt, 0)))
        inputs.append(mask.astype(jnp.bool_))
    in_specs += [w_spec, w_spec, w_spec, w_spec]
    inputs += [WqT, WkT, WvT, WoT]

    kernel = functools.partial(_mh_kernel, has_mask=has_mask, n_splits=n_splits,
                               dk=dk, compute_dtype=compute_dtype)

    in_itemsize = jnp.dtype(Q.dtype).itemsize
    cd_itemsize = jnp.dtype(compute_dtype).itemsize
    est = _vmem_budget_bytes(S, H, tq, in_itemsize, cd_itemsize, has_mask)
    vmem_limit = int(min(max(32 << 20, 2 * est), 64 << 20))   # v7x-safe clamp

    return pl.pallas_call(
        kernel,
        out_shape=jax.ShapeDtypeStruct((B, S, H), Q.dtype),
        grid_spec=pltpu.PrefetchScalarGridSpec(
            num_scalar_prefetch=0,
            grid=(B, nq),
            in_specs=in_specs,
            out_specs=o_spec,
            scratch_shapes=[
                pltpu.VMEM((S, H), compute_dtype),   # cached projected K
                pltpu.VMEM((S, H), compute_dtype),   # cached projected V
                pltpu.VMEM((tq, H), compute_dtype),  # concatenated head context
            ],
        ),
        compiler_params=pltpu.CompilerParams(
            # qt axis must be sequential: K/V scratch is filled at qt == 0.
            dimension_semantics=("parallel", "arbitrary"),
            vmem_limit_bytes=vmem_limit),
    )(*inputs)


def multihead_reference(Q, K, V, Wq, Wk, Wv, Wo, n_splits, mask=None):
    """Pure-JAX reference mirroring the PyTorch module semantics exactly."""
    H = Q.shape[-1]
    dk = H // n_splits

    QW = Q @ Wq.T
    KW = K @ Wk.T
    VW = V @ Wv.T

    def split_cat(x):   # split on last dim, cat on batch dim -> (B*n_splits, S, dk)
        return jnp.concatenate(jnp.split(x, n_splits, axis=-1), axis=0)

    QWs, KWs, VWs = split_cat(QW), split_cat(KW), split_cat(VW)

    w = jnp.einsum('bqd,bkd->bqk', QWs, KWs)
    if mask is not None:
        mask_rep = jnp.concatenate([mask] * n_splits, axis=0)
        w = jnp.where(mask_rep, -jnp.inf, w)
    w = jax.nn.softmax(w / math.sqrt(dk), axis=-1)
    c = jnp.einsum('bqk,bkd->bqd', w, VWs)

    c = jnp.concatenate(jnp.split(c, n_splits, axis=0), axis=-1)
    return c @ Wo.T


if __name__ == "__main__":
    B, S, H, n_splits = 2, 8, 32, 4

    key = jax.random.PRNGKey(0)
    kq, kk, kv, kwq, kwk, kwv, kwo = jax.random.split(key, 7)

    Q = jax.random.normal(kq, (B, S, H), dtype=jnp.float32)
    K = jax.random.normal(kk, (B, S, H), dtype=jnp.float32)
    V = jax.random.normal(kv, (B, S, H), dtype=jnp.float32)

    # PyTorch Linear weight shape: (out, in).
    bound = 1.0 / math.sqrt(H)
    Wq = jax.random.uniform(kwq, (H, H), jnp.float32, -bound, bound)
    Wk = jax.random.uniform(kwk, (H, H), jnp.float32, -bound, bound)
    Wv = jax.random.uniform(kwv, (H, H), jnp.float32, -bound, bound)
    Wo = jax.random.uniform(kwo, (H, H), jnp.float32, -bound, bound)

    # --- no-mask path (mask input is not materialized / not DMA'd) ---
    out = multihead_forward(Q, K, V, Wq, Wk, Wv, Wo, n_splits, mask=None)
    out = jax.block_until_ready(out)
    ref = multihead_reference(Q, K, V, Wq, Wk, Wv, Wo, n_splits, mask=None)
    assert out.shape == (B, S, H)
    assert jnp.allclose(out, ref, atol=5e-3, rtol=5e-3), "mismatch vs reference (no mask)"

    # --- masked path (causal mask; no fully-masked rows, matching PyTorch semantics) ---
    causal = jnp.triu(jnp.ones((S, S), dtype=jnp.int32), k=1).astype(jnp.bool_)
    mask = jnp.broadcast_to(causal, (B, S, S))
    out_m = jax.block_until_ready(
        multihead_forward(Q, K, V, Wq, Wk, Wv, Wo, n_splits, mask=mask))
    ref_m = multihead_reference(Q, K, V, Wq, Wk, Wv, Wo, n_splits, mask=mask)
    assert jnp.allclose(out_m, ref_m, atol=5e-3, rtol=5e-3), "mismatch vs reference (mask)"

    print("KERNEL_OK")
</pallas_src>

<mosaic_0001>
module attributes {stable_mosaic.version = 11 : i64} {
  func.func @_mh_kernel(%arg0: i32, %arg1: i32, %arg2: memref<1x8x32xf32, #tpu.memory_space<vmem>>, %arg3: memref<1x8x32xf32, #tpu.memory_space<vmem>>, %arg4: memref<1x8x32xf32, #tpu.memory_space<vmem>>, %arg5: memref<32x32xf32, #tpu.memory_space<vmem>>, %arg6: memref<32x32xf32, #tpu.memory_space<vmem>>, %arg7: memref<32x32xf32, #tpu.memory_space<vmem>>, %arg8: memref<32x32xf32, #tpu.memory_space<vmem>>, %arg9: memref<1x8x32xf32, #tpu.memory_space<vmem>>, %arg10: memref<8x32xf32, #tpu.memory_space<vmem>>, %arg11: memref<8x32xf32, #tpu.memory_space<vmem>>, %arg12: memref<8x32xf32, #tpu.memory_space<vmem>>) attributes {dimension_semantics = [#tpu.dimension_semantics<parallel>, #tpu.dimension_semantics<arbitrary>], iteration_bounds = array<i64: 2, 1>, scalar_prefetch = 0 : i64, scratch_operands = 3 : i64, tpu.core_type = #tpu.core_type<tc>, window_params = [{transform_indices = @transform_0, window_bounds = array<i64: 1, 8, 32>}, {transform_indices = @transform_1, window_bounds = array<i64: 1, 8, 32>}, {transform_indices = @transform_2, window_bounds = array<i64: 1, 8, 32>}, {pipeline_mode = #tpu.pipeline_mode<synchronous>, transform_indices = @transform_3, window_bounds = array<i64: 32, 32>}, {pipeline_mode = #tpu.pipeline_mode<synchronous>, transform_indices = @transform_4, window_bounds = array<i64: 32, 32>}, {pipeline_mode = #tpu.pipeline_mode<synchronous>, transform_indices = @transform_5, window_bounds = array<i64: 32, 32>}, {pipeline_mode = #tpu.pipeline_mode<synchronous>, transform_indices = @transform_6, window_bounds = array<i64: 32, 32>}, {transform_indices = @transform_7, window_bounds = array<i64: 1, 8, 32>}]} {
    %c0_i32 = arith.constant 0 : i32
    %0 = arith.cmpi eq, %arg1, %c0_i32 : i32
    %1 = arith.extui %0 : i1 to i32
    %c0_i32_0 = arith.constant 0 : i32
    %2 = arith.cmpi ne, %1, %c0_i32_0 : i32
    scf.if %2 {
      %c0_50 = arith.constant 0 : index
      %c0_51 = arith.constant 0 : index
      %c0_52 = arith.constant 0 : index
      %77 = vector.load %arg3[%c0_50, %c0_51, %c0_52] : memref<1x8x32xf32, #tpu.memory_space<vmem>>, vector<1x8x32xf32>
      %78 = vector.shape_cast %77 : vector<1x8x32xf32> to vector<8x32xf32>
      %c0_53 = arith.constant 0 : index
      %c0_54 = arith.constant 0 : index
      %c0_55 = arith.constant 0 : index
      %79 = vector.load %arg4[%c0_53, %c0_54, %c0_55] : memref<1x8x32xf32, #tpu.memory_space<vmem>>, vector<1x8x32xf32>
      %80 = vector.shape_cast %79 : vector<1x8x32xf32> to vector<8x32xf32>
      %c0_56 = arith.constant 0 : index
      %c0_57 = arith.constant 0 : index
      %81 = vector.load %arg6[%c0_56, %c0_57] : memref<32x32xf32, #tpu.memory_space<vmem>>, vector<32x32xf32>
      %cst_58 = arith.constant dense<0.000000e+00> : vector<8x32xf32>
      %82 = tpu.matmul %78, %81, %cst_58 {dimension_numbers = #tpu.dot_dimension_numbers<[1], [0], [0], [1], [0, 0, 1, 1], [], []>} : vector<8x32xf32>, vector<32x32xf32>, vector<8x32xf32> -> vector<8x32xf32>
      %c0_59 = arith.constant 0 : index
      %c0_60 = arith.constant 0 : index
      %83 = vector.load %arg10[%c0_59, %c0_60] : memref<8x32xf32, #tpu.memory_space<vmem>>, vector<8x32xf32>
      tpu.vector_store %arg10[%c0_59, %c0_60], %82 {strides = array<i32>} : memref<8x32xf32, #tpu.memory_space<vmem>>, vector<8x32xf32>,
      %c0_61 = arith.constant 0 : index
      %c0_62 = arith.constant 0 : index
      %84 = vector.load %arg7[%c0_61, %c0_62] : memref<32x32xf32, #tpu.memory_space<vmem>>, vector<32x32xf32>
      %cst_63 = arith.constant dense<0.000000e+00> : vector<8x32xf32>
      %85 = tpu.matmul %80, %84, %cst_63 {dimension_numbers = #tpu.dot_dimension_numbers<[1], [0], [0], [1], [0, 0, 1, 1], [], []>} : vector<8x32xf32>, vector<32x32xf32>, vector<8x32xf32> -> vector<8x32xf32>
      %c0_64 = arith.constant 0 : index
      %c0_65 = arith.constant 0 : index
      %86 = vector.load %arg11[%c0_64, %c0_65] : memref<8x32xf32, #tpu.memory_space<vmem>>, vector<8x32xf32>
      tpu.vector_store %arg11[%c0_64, %c0_65], %85 {strides = array<i32>} : memref<8x32xf32, #tpu.memory_space<vmem>>, vector<8x32xf32>,
    } else {
    }
    %c0 = arith.constant 0 : index
    %c0_1 = arith.constant 0 : index
    %c0_2 = arith.constant 0 : index
    %3 = vector.load %arg2[%c0, %c0_1, %c0_2] : memref<1x8x32xf32, #tpu.memory_space<vmem>>, vector<1x8x32xf32>
    %4 = vector.shape_cast %3 : vector<1x8x32xf32> to vector<8x32xf32>
    %c0_3 = arith.constant 0 : index
    %c0_4 = arith.constant 0 : index
    %5 = vector.load %arg5[%c0_3, %c0_4] : memref<32x32xf32, #tpu.memory_space<vmem>>, vector<32x32xf32>
    %cst = arith.constant dense<0.000000e+00> : vector<8x32xf32>
    %6 = tpu.matmul %4, %5, %cst {dimension_numbers = #tpu.dot_dimension_numbers<[1], [0], [0], [1], [0, 0, 1, 1], [], []>} : vector<8x32xf32>, vector<32x32xf32>, vector<8x32xf32> -> vector<8x32xf32>
    %7 = vector.extract_strided_slice %6 {offsets = [0, 0], sizes = [8, 8], strides = [1, 1]} : vector<8x32xf32> to vector<8x8xf32>
    %c0_5 = arith.constant 0 : index
    %c0_6 = arith.constant 0 : index
    %8 = vector.load %arg10[%c0_5, %c0_6] : memref<8x32xf32, #tpu.memory_space<vmem>>, vector<8x8xf32>
    %c0_7 = arith.constant 0 : index
    %c0_8 = arith.constant 0 : index
    %9 = vector.load %arg11[%c0_7, %c0_8] : memref<8x32xf32, #tpu.memory_space<vmem>>, vector<8x8xf32>
    %cst_9 = arith.constant dense<0.000000e+00> : vector<8x8xf32>
    %10 = tpu.matmul %7, %8, %cst_9 {dimension_numbers = #tpu.dot_dimension_numbers<[1], [1], [0], [0], [0, 0, 1, 0], [], []>} : vector<8x8xf32>, vector<8x8xf32>, vector<8x8xf32> -> vector<8x8xf32>
    %cst_10 = arith.constant dense<0xFF800000> : vector<8xf32>
    %11 = vector.multi_reduction <maximumf>, %10, %cst_10 [1] : vector<8x8xf32> to vector<8xf32>
    %12 = vector.shape_cast %11 : vector<8xf32> to vector<8x1xf32>
    %13 = vector.broadcast %12 : vector<8x1xf32> to vector<8x8xf32>
    %14 = arith.subf %10, %13 : vector<8x8xf32>
    %15 = math.exp %14 : vector<8x8xf32>
    %cst_11 = arith.constant dense<0.000000e+00> : vector<8xf32>
    %16 = vector.multi_reduction <add>, %15, %cst_11 [1] : vector<8x8xf32> to vector<8xf32>
    %17 = vector.shape_cast %16 : vector<8xf32> to vector<8x1xf32>
    %18 = tpu.reciprocal %17 {approx = true} : vector<8x1xf32> -> vector<8x1xf32>
    %19 = vector.broadcast %18 : vector<8x1xf32> to vector<8x8xf32>
    %20 = arith.mulf %15, %19 : vector<8x8xf32>
    %cst_12 = arith.constant dense<0.000000e+00> : vector<8x8xf32>
    %21 = tpu.matmul %20, %9, %cst_12 {dimension_numbers = #tpu.dot_dimension_numbers<[1], [0], [0], [1], [0, 0, 1, 1], [], []>} : vector<8x8xf32>, vector<8x8xf32>, vector<8x8xf32> -> vector<8x8xf32>
    %c0_13 = arith.constant 0 : index
    %c0_14 = arith.constant 0 : index
    %22 = vector.load %arg12[%c0_13, %c0_14] : memref<8x32xf32, #tpu.memory_space<vmem>>, vector<8x8xf32>
    tpu.vector_store %arg12[%c0_13, %c0_14], %21 {strides = array<i32>} : memref<8x32xf32, #tpu.memory_space<vmem>>, vector<8x8xf32>,
    %23 = vector.extract_strided_slice %6 {offsets = [0, 8], sizes = [8, 8], strides = [1, 1]} : vector<8x32xf32> to vector<8x8xf32>
    %c0_15 = arith.constant 0 : index
    %c8 = arith.constant 8 : index
    %24 = vector.load %arg10[%c0_15, %c8] : memref<8x32xf32, #tpu.memory_space<vmem>>, vector<8x8xf32>
    %c0_16 = arith.constant 0 : index
    %c8_17 = arith.constant 8 : index
    %25 = vector.load %arg11[%c0_16, %c8_17] : memref<8x32xf32, #tpu.memory_space<vmem>>, vector<8x8xf32>
    %cst_18 = arith.constant dense<0.000000e+00> : vector<8x8xf32>
    %26 = tpu.matmul %23, %24, %cst_18 {dimension_numbers = #tpu.dot_dimension_numbers<[1], [1], [0], [0], [0, 0, 1, 0], [], []>} : vector<8x8xf32>, vector<8x8xf32>, vector<8x8xf32> -> vector<8x8xf32>
    %cst_19 = arith.constant dense<0xFF800000> : vector<8xf32>
    %27 = vector.multi_reduction <maximumf>, %26, %cst_19 [1] : vector<8x8xf32> to vector<8xf32>
    %28 = vector.shape_cast %27 : vector<8xf32> to vector<8x1xf32>
    %29 = vector.broadcast %28 : vector<8x1xf32> to vector<8x8xf32>
    %30 = arith.subf %26, %29 : vector<8x8xf32>
    %31 = math.exp %30 : vector<8x8xf32>
    %cst_20 = arith.constant dense<0.000000e+00> : vector<8xf32>
    %32 = vector.multi_reduction <add>, %31, %cst_20 [1] : vector<8x8xf32> to vector<8xf32>
    %33 = vector.shape_cast %32 : vector<8xf32> to vector<8x1xf32>
    %34 = tpu.reciprocal %33 {approx = true} : vector<8x1xf32> -> vector<8x1xf32>
    %35 = vector.broadcast %34 : vector<8x1xf32> to vector<8x8xf32>
    %36 = arith.mulf %31, %35 : vector<8x8xf32>
    %cst_21 = arith.constant dense<0.000000e+00> : vector<8x8xf32>
    %37 = tpu.matmul %36, %25, %cst_21 {dimension_numbers = #tpu.dot_dimension_numbers<[1], [0], [0], [1], [0, 0, 1, 1], [], []>} : vector<8x8xf32>, vector<8x8xf32>, vector<8x8xf32> -> vector<8x8xf32>
    %c0_22 = arith.constant 0 : index
    %c8_23 = arith.constant 8 : index
    %38 = vector.load %arg12[%c0_22, %c8_23] : memref<8x32xf32, #tpu.memory_space<vmem>>, vector<8x8xf32>
    tpu.vector_store %arg12[%c0_22, %c8_23], %37 {strides = array<i32>} : memref<8x32xf32, #tpu.memory_space<vmem>>, vector<8x8xf32>,
    %39 = vector.extract_strided_slice %6 {offsets = [0, 16], sizes = [8, 8], strides = [1, 1]} : vector<8x32xf32> to vector<8x8xf32>
    %c0_24 = arith.constant 0 : index
    %c16 = arith.constant 16 : index
    %40 = vector.load %arg10[%c0_24, %c16] : memref<8x32xf32, #tpu.memory_space<vmem>>, vector<8x8xf32>
    %c0_25 = arith.constant 0 : index
    %c16_26 = arith.constant 16 : index
    %41 = vector.load %arg11[%c0_25, %c16_26] : memref<8x32xf32, #tpu.memory_space<vmem>>, vector<8x8xf32>
    %cst_27 = arith.constant dense<0.000000e+00> : vector<8x8xf32>
    %42 = tpu.matmul %39, %40, %cst_27 {dimension_numbers = #tpu.dot_dimension_numbers<[1], [1], [0], [0], [0, 0, 1, 0], [], []>} : vector<8x8xf32>, vector<8x8xf32>, vector<8x8xf32> -> vector<8x8xf32>
    %cst_28 = arith.constant dense<0xFF800000> : vector<8xf32>
    %43 = vector.multi_reduction <maximumf>, %42, %cst_28 [1] : vector<8x8xf32> to vector<8xf32>
    %44 = vector.shape_cast %43 : vector<8xf32> to vector<8x1xf32>
    %45 = vector.broadcast %44 : vector<8x1xf32> to vector<8x8xf32>
    %46 = arith.subf %42, %45 : vector<8x8xf32>
    %47 = math.exp %46 : vector<8x8xf32>
    %cst_29 = arith.constant dense<0.000000e+00> : vector<8xf32>
    %48 = vector.multi_reduction <add>, %47, %cst_29 [1] : vector<8x8xf32> to vector<8xf32>
    %49 = vector.shape_cast %48 : vector<8xf32> to vector<8x1xf32>
    %50 = tpu.reciprocal %49 {approx = true} : vector<8x1xf32> -> vector<8x1xf32>
    %51 = vector.broadcast %50 : vector<8x1xf32> to vector<8x8xf32>
    %52 = arith.mulf %47, %51 : vector<8x8xf32>
    %cst_30 = arith.constant dense<0.000000e+00> : vector<8x8xf32>
    %53 = tpu.matmul %52, %41, %cst_30 {dimension_numbers = #tpu.dot_dimension_numbers<[1], [0], [0], [1], [0, 0, 1, 1], [], []>} : vector<8x8xf32>, vector<8x8xf32>, vector<8x8xf32> -> vector<8x8xf32>
    %c0_31 = arith.constant 0 : index
    %c16_32 = arith.constant 16 : index
    %54 = vector.load %arg12[%c0_31, %c16_32] : memref<8x32xf32, #tpu.memory_space<vmem>>, vector<8x8xf32>
    tpu.vector_store %arg12[%c0_31, %c16_32], %53 {strides = array<i32>} : memref<8x32xf32, #tpu.memory_space<vmem>>, vector<8x8xf32>,
    %55 = vector.extract_strided_slice %6 {offsets = [0, 24], sizes = [8, 8], strides = [1, 1]} : vector<8x32xf32> to vector<8x8xf32>
    %c0_33 = arith.constant 0 : index
    %c24 = arith.constant 24 : index
    %56 = vector.load %arg10[%c0_33, %c24] : memref<8x32xf32, #tpu.memory_space<vmem>>, vector<8x8xf32>
    %c0_34 = arith.constant 0 : index
    %c24_35 = arith.constant 24 : index
    %57 = vector.load %arg11[%c0_34, %c24_35] : memref<8x32xf32, #tpu.memory_space<vmem>>, vector<8x8xf32>
    %cst_36 = arith.constant dense<0.000000e+00> : vector<8x8xf32>
    %58 = tpu.matmul %55, %56, %cst_36 {dimension_numbers = #tpu.dot_dimension_numbers<[1], [1], [0], [0], [0, 0, 1, 0], [], []>} : vector<8x8xf32>, vector<8x8xf32>, vector<8x8xf32> -> vector<8x8xf32>
    %cst_37 = arith.constant dense<0xFF800000> : vector<8xf32>
    %59 = vector.multi_reduction <maximumf>, %58, %cst_37 [1] : vector<8x8xf32> to vector<8xf32>
    %60 = vector.shape_cast %59 : vector<8xf32> to vector<8x1xf32>
    %61 = vector.broadcast %60 : vector<8x1xf32> to vector<8x8xf32>
    %62 = arith.subf %58, %61 : vector<8x8xf32>
    %63 = math.exp %62 : vector<8x8xf32>
    %cst_38 = arith.constant dense<0.000000e+00> : vector<8xf32>
    %64 = vector.multi_reduction <add>, %63, %cst_38 [1] : vector<8x8xf32> to vector<8xf32>
    %65 = vector.shape_cast %64 : vector<8xf32> to vector<8x1xf32>
    %66 = tpu.reciprocal %65 {approx = true} : vector<8x1xf32> -> vector<8x1xf32>
    %67 = vector.broadcast %66 : vector<8x1xf32> to vector<8x8xf32>
    %68 = arith.mulf %63, %67 : vector<8x8xf32>
    %cst_39 = arith.constant dense<0.000000e+00> : vector<8x8xf32>
    %69 = tpu.matmul %68, %57, %cst_39 {dimension_numbers = #tpu.dot_dimension_numbers<[1], [0], [0], [1], [0, 0, 1, 1], [], []>} : vector<8x8xf32>, vector<8x8xf32>, vector<8x8xf32> -> vector<8x8xf32>
    %c0_40 = arith.constant 0 : index
    %c24_41 = arith.constant 24 : index
    %70 = vector.load %arg12[%c0_40, %c24_41] : memref<8x32xf32, #tpu.memory_space<vmem>>, vector<8x8xf32>
    tpu.vector_store %arg12[%c0_40, %c24_41], %69 {strides = array<i32>} : memref<8x32xf32, #tpu.memory_space<vmem>>, vector<8x8xf32>,
    %c0_42 = arith.constant 0 : index
    %c0_43 = arith.constant 0 : index
    %71 = vector.load %arg12[%c0_42, %c0_43] : memref<8x32xf32, #tpu.memory_space<vmem>>, vector<8x32xf32>
    %c0_44 = arith.constant 0 : index
    %c0_45 = arith.constant 0 : index
    %72 = vector.load %arg8[%c0_44, %c0_45] : memref<32x32xf32, #tpu.memory_space<vmem>>, vector<32x32xf32>
    %cst_46 = arith.constant dense<0.000000e+00> : vector<8x32xf32>
    %73 = tpu.matmul %71, %72, %cst_46 {dimension_numbers = #tpu.dot_dimension_numbers<[1], [0], [0], [1], [0, 0, 1, 1], [], []>} : vector<8x32xf32>, vector<32x32xf32>, vector<8x32xf32> -> vector<8x32xf32>
    %c0_47 = arith.constant 0 : index
    %c0_48 = arith.constant 0 : index
    %c0_49 = arith.constant 0 : index
    %74 = vector.load %arg9[%c0_47, %c0_48, %c0_49] : memref<1x8x32xf32, #tpu.memory_space<vmem>>, vector<1x8x32xf32>
    %75 = vector.shape_cast %74 : vector<1x8x32xf32> to vector<8x32xf32>
    %76 = vector.shape_cast %73 : vector<8x32xf32> to vector<1x8x32xf32>
    tpu.vector_store %arg9[%c0_47, %c0_48, %c0_49], %76 {strides = array<i32>} : memref<1x8x32xf32, #tpu.memory_space<vmem>>, vector<1x8x32xf32>,
    return
  }
  func.func @transform_0(%arg0: i32, %arg1: i32) -> (i32, i32, i32) {
    %c0_i32 = arith.constant 0 : i32
    %c0_i32_0 = arith.constant 0 : i32
    return %arg0, %arg1, %c0_i32 : i32, i32, i32
  }
  func.func @transform_1(%arg0: i32, %arg1: i32) -> (i32, i32, i32) {
    %c0_i32 = arith.constant 0 : i32
    %c0_i32_0 = arith.constant 0 : i32
    %c0_i32_1 = arith.constant 0 : i32
    return %arg0, %c0_i32, %c0_i32_0 : i32, i32, i32
  }
  func.func @transform_2(%arg0: i32, %arg1: i32) -> (i32, i32, i32) {
    %c0_i32 = arith.constant 0 : i32
    %c0_i32_0 = arith.constant 0 : i32
    %c0_i32_1 = arith.constant 0 : i32
    return %arg0, %c0_i32, %c0_i32_0 : i32, i32, i32
  }
  func.func @transform_3(%arg0: i32, %arg1: i32) -> (i32, i32) {
    %c0_i32 = arith.constant 0 : i32
    %c0_i32_0 = arith.constant 0 : i32
    %c0_i32_1 = arith.constant 0 : i32
    return %c0_i32, %c0_i32_0 : i32, i32
  }
  func.func @transform_4(%arg0: i32, %arg1: i32) -> (i32, i32) {
    %c0_i32 = arith.constant 0 : i32
    %c0_i32_0 = arith.constant 0 : i32
    %c0_i32_1 = arith.constant 0 : i32
    return %c0_i32, %c0_i32_0 : i32, i32
  }
  func.func @transform_5(%arg0: i32, %arg1: i32) -> (i32, i32) {
    %c0_i32 = arith.constant 0 : i32
    %c0_i32_0 = arith.constant 0 : i32
    %c0_i32_1 = arith.constant 0 : i32
    return %c0_i32, %c0_i32_0 : i32, i32
  }
  func.func @transform_6(%arg0: i32, %arg1: i32) -> (i32, i32) {
    %c0_i32 = arith.constant 0 : i32
    %c0_i32_0 = arith.constant 0 : i32
    %c0_i32_1 = arith.constant 0 : i32
    return %c0_i32, %c0_i32_0 : i32, i32
  }
  func.func @transform_7(%arg0: i32, %arg1: i32) -> (i32, i32, i32) {
    %c0_i32 = arith.constant 0 : i32
    %c0_i32_0 = arith.constant 0 : i32
    return %arg0, %arg1, %c0_i32 : i32, i32, i32
  }
}

</mosaic_0001>

<bundles_post_ra>
// kernel: tpu_custom_call.1
= control target key start
LH: loop header
LB: loop body
LE: loop exit
PB: predicated region body
PF: predicated region fallthrough
CT: control target
= control target key end

     0   :  { %s1841_s0 = inlined_call_operand.hbm [shape: f32[2,8,32], index: 0, kind: input, shape index: {}]   ;;  %s1842_s1 = inlined_call_operand.hbm [shape: f32[2,8,32], index: 1, kind: input, shape index: {}]   ;;  %s1843_s2 = inlined_call_operand.hbm [shape: f32[2,8,32], index: 2, kind: input, shape index: {}]   ;;  %s1844_s3 = inlined_call_operand.hbm [shape: f32[32,32], index: 3, kind: input, shape index: {}]   ;;  %s1845_s4 = inlined_call_operand.hbm [shape: f32[32,32], index: 4, kind: input, shape index: {}]   ;;  %s1846_s5 = inlined_call_operand.hbm [shape: f32[32,32], index: 5, kind: input, shape index: {}]   ;;  %s1847_s6 = inlined_call_operand.hbm [shape: f32[32,32], index: 6, kind: input, shape index: {}]   ;;  %s1848_s7 = inlined_call_operand.hbm [shape: f32[2,8,32], index: 7, kind: output, shape index: {}]  }
   0x1   :  { %1858 = sst [smem:[#allocation27_spill]] %s1841_s0 }
   0x2   :  { %1859 = sst [smem:[#allocation28_spill]] %s1842_s1 }
   0x3   :  { %1860 = sst [smem:[#allocation29_spill]] %s1844_s3 }
   0x4   :  { %1861 = sst [smem:[#allocation30_spill]] %s1845_s4 }
   0x5   :  { %1862 = sst [smem:[#allocation31_spill]] %s1846_s5 }
   0x6   :  { %1863 = sst [smem:[#allocation32_spill]] %s1847_s6 }
   0x7   :  { %12 = vsyncpa [#allocation6], 0 }
   0x8   :  { %14 = vsyncpa [#allocation6 + $0x1], 0 }
   0x9   :  { %15 = vsyncpa [#allocation9], 0 }
   0xa   :  { %17 = vsyncpa [#allocation9 + $0x1], 0 }
   0xb   :  { %18 = vsyncpa [#allocation12], 0 }
   0xc   :  { %19 = vsyncpa [#allocation15], 0 }
   0xd   :  { %20 = vsyncpa [#allocation7], 0 }
   0xe   :  { %22 = vsyncpa [#allocation7 + $0x1], 0  ;;  %s1580_s24 = smov 0   ;;  %s1582_s25 = smov 0  }
   0xf   :  { %s1584_s26 = smov 0   ;;  %s1586_s27 = smov 0  }
  0x10   :  { %s1588_s28 = smov 0   ;;  %s1590_s29 = smov 0  }
  0x11 LB: > { %1864 = sst [smem:[#allocation23_spill]] %s1522_s28  ;;  %s1611_s30 = sadd.s32 4294967295, %s1526_s29   ;;  %s1526_s29 = sphi %s1590_s29, %s28_s29   ;;  %s1522_s28 = sphi %s1588_s28, %s1887_s28   ;;  %s1518_s27 = sphi %s1586_s27, %s1886_s27   ;;  %s1514_s26 = sphi %s1584_s26, %s1890_s26   ;;  %s1510_s25 = sphi %s1582_s25, %s1889_s25   ;;  %s1506_s24 = sphi %s1580_s24, %s1888_s24  }
  0x12   : > { %1865 = sst [smem:[#allocation24_spill]] %s1526_s29  ;;  %p1044_p0 = scmp.ge.s32.totalorder %s1526_s29, 1 }
  0x13   : > { %p63_p1 = scmp.eq.s32.totalorder %s1611_s30, 0  ;;  %p237_p2 = scmp.lt.s32.totalorder %s1526_s29, 3 }
  0x14   : > { %s1866_s3 = sld [smem:[#allocation29_spill]]  ;;  %s1528_s12 = smov [#allocation11]  }
  0x15   : > { %p1619_p3 = pnand %p1044_p0, %p237_p2  ;;  %s250_s13 = sshll.u32 %s1528_s12, 4  ;;  %s251_s13 = int_to_ptr.vmem [resolvable:$true] %s250_s13 }
  0x16   : > { %p1049_p6 = scmp.ge.s32.totalorder %s1526_s29, 2  ;;  %s1869_s5 = sld [smem:[#allocation31_spill]] }
  0x17   : > { %p1109_p4 = pneg %p1619_p3  ;;  %s1849_s18 = smov 128  }
  0x18   : > { %s1851_s19 = smov 8   ;;  %s1531_s20 = smov [#allocation14]  }
  0x19   : > { %p1627_p5 = pnand %p1109_p4, %p63_p1  ;;  %s278_s21 = sshll.u32 %s1531_s20, 4  ;;  %s279_s21 = int_to_ptr.vmem [resolvable:$true] %s278_s21 }
  0x1a   : > { %s248_s10 = sshll.u32 %s1866_s3, 4  ;;  %s1043_s22 = sadd.s32 4294967294, %s1526_s29   ;;  %s249_s10 = int_to_ptr.hbm [resolvable:$true] %s248_s10 }
  0x1b   : > { %1112 = dma.hbm_to_vmem [thread:$0]  (!%p1627_p5), %s249_s10, 512, %s251_s13, [#allocation12], %s1849_s18, %s1849_s18, %s1851_s19  }
  0x1c   : > { %s276_s17 = sshll.u32 %s1869_s5, 4  ;;  %s40_s23 = sadd.s32 1, %s1522_s28  ;;  %s277_s17 = int_to_ptr.hbm [resolvable:$true] %s276_s17 }
  0x1d   : > { %1118 = dma.hbm_to_vmem [thread:$0]  (!%p1627_p5), %s277_s17, 512, %s279_s21, [#allocation15], %s1849_s18, %s1849_s18, %s1851_s19  }
  0x1e   : > { %p42_p7 = scmp.ge.s32.totalorder %s40_s23, 2  ;;  %s49_s8 = sadd.s32 1, %s1514_s26 }
  0x1f   : > { %p56_p8 = scmp.ne.s32.totalorder %s1514_s26, %s1510_s25  ;;  %p57_p9 = scmp.eq.s32.totalorder %s1526_s29, 0 }
  0x20   : > { %s1892_s23 = smov (%p42_p7, %s40_s23), 0  ;;  %p62_p11 = scmp.ne.s32.totalorder %s1510_s25, %s1506_s24 }
  0x21   : > { %1870 = sst [smem:[#allocation25_spill]] %s1892_s23  ;;  %p1653_p10 = por %p57_p9, %p56_p8 }
  0x22   : > { %s44_s10 = ssub.s32 %s1522_s28, %s1892_s23  ;;  %p224_p12 = scmp.eq.s32.totalorder %s1611_s30, 1 }
  0x23   : > { %p47_p13 = scmp.eq.s32.totalorder %s44_s10, 0  ;;  %p1664_p0 = por %p63_p1, %p62_p11 }
  0x24   : > { %p1668_p2 = por %p224_p12, %p56_p8  ;;  %p230_p4 = scmp.eq.s32.totalorder %s1043_s22, 1 }
  0x25   : > { %s1673_s15 = scalar_select %p47_p13, %s1514_s26, %s49_s8  }
  0x26   : > { %p1675_p7 = por %p230_p4, %p62_p11  ;;  %p1140_p9 = scmp.lt.s32.totalorder %s1526_s29, 2 }
  0x27   : > { %1874 = sst [smem:[#allocation26_spill]] %s1673_s15  ;;  %s1854_s17 = sand.u32 1, %s1514_s26  }
  0x28   : > { %s1682_s20 = sshll.u32 %s1522_s28, 3  ;;  %s1686_s21 = sshll.u32 %s1854_s17, 3 }
  0x29   : > { %p1690_p8 = pnand %p1140_p9, %p1653_p10  ;;  %s326_s22 = sand.u32 1, %s1526_s29  }
  0x2a   : > { %s1877_s1 = sld [smem:[#allocation28_spill]]  ;;  %s330_s3 = scalar_lea.vmem [#allocation8], %s1686_s21 }
  0x2b   : > { %s338_s5 = sshll.u32 %s330_s3, 4  ;;  %s1878_s4 = sld [smem:[#allocation30_spill]]  ;;  %s339_s5 = int_to_ptr.vmem [resolvable:$true] %s338_s5 }
  0x2c   : > { %s327_s15 = scalar_lea.sflag [#allocation9], %s326_s22  ;;  %s1532_s29 = smov [#allocation13]  }
  0x2d   : > { %s264_s18 = sshll.u32 %s1532_s29, 4  ;;  %s1879_s6 = sld [smem:[#allocation32_spill]]  ;;  %s265_s18 = int_to_ptr.vmem [resolvable:$true] %s264_s18 }
  0x2e   : > { %s1881_s17 = smov 128   ;;  %s1533_s22 = smov [#allocation16]  }
  0x2f   : > { %s1882_s0 = sld [smem:[#allocation27_spill]]  ;;  %s310_s8 = scalar_lea.vmem [#allocation5], %s1686_s21 }
  0x30   : > { %s334_s19 = scalar_lea.hbm %s1877_s1, %s1682_s20 }
  0x31   : > { %s336_s23 = sshll.u32 %s334_s19, 4  ;;  %s262_s28 = sshll.u32 %s1878_s4, 4  ;;  %s337_s23 = int_to_ptr.hbm [resolvable:$true] %s336_s23  ;;  %s263_s28 = int_to_ptr.hbm [resolvable:$true] %s262_s28 }
  0x32   : > { %1128 = dma.hbm_to_vmem [thread:$0]  (!%p1690_p8), %s337_s23, 128, %s339_s5, %s327_s15  }
  0x33   : > { %s290_s3 = sshll.u32 %s1879_s6, 4  ;;  %s1880_s19 = smov 8   ;;  %s291_s3 = int_to_ptr.hbm [resolvable:$true] %s290_s3 }
  0x34   : > { %1115 = dma.hbm_to_vmem [thread:$0]  (!%p1627_p5), %s263_s28, 512, %s265_s18, [#allocation12], %s1881_s17, %s1881_s17, %s1880_s19  }
  0x35   : > { %s292_s5 = sshll.u32 %s1533_s22, 4  ;;  %s315_s29 = scalar_lea.hbm %s1882_s0, %s1682_s20  ;;  %s293_s5 = int_to_ptr.vmem [resolvable:$true] %s292_s5 }
  0x36   : > { %1121 = dma.hbm_to_vmem [thread:$0]  (!%p1627_p5), %s291_s3, 512, %s293_s5, [#allocation15], %s1881_s17, %s1881_s17, %s1880_s19  }
  0x37   : > { %s317_s1 = sshll.u32 %s315_s29, 4  ;;  %s319_s4 = sshll.u32 %s310_s8, 4  ;;  %s318_s1 = int_to_ptr.hbm [resolvable:$true] %s317_s1  ;;  %s320_s4 = int_to_ptr.vmem [resolvable:$true] %s319_s4 }
  0x38   : > { %s1883_s6 = sand.u32 1, %s1514_s26   ;;  %s353_s23 = scalar_lea.hbm %s1843_s2, %s1682_s20 }
  0x39   : > { %s307_s28 = scalar_lea.sflag [#allocation6], %s1883_s6  ;;  %s355_s9 = sshll.u32 %s353_s23, 4  ;;  %s356_s9 = int_to_ptr.hbm [resolvable:$true] %s355_s9 }
  0x3a   : > { %1125 = dma.hbm_to_vmem [thread:$0]  (!%p1690_p8), %s318_s1, 128, %s320_s4, %s307_s28  }
  0x3b   : > { %s349_s0 = scalar_lea.vmem [#allocation10], %s1686_s21  ;;  %366 = sbr.rel (%p1619_p3) target bundleno = 1120 (0x460), region = 48 }
  0x3c   : > { %s357_s14 = sshll.u32 %s349_s0, 4  ;;  %s1737_s3 = sand.u32 (!%p1619_p3), 1, %s1510_s25   ;;  %s358_s14 = int_to_ptr.vmem [resolvable:$true] %s357_s14 }
  0x3d   : > { %1131 = dma.hbm_to_vmem [thread:$0]  (!%p1690_p8), %s356_s9, 128, %s358_s14, %s327_s15  }
  0x3e   : > { %s1740_s4 = sshll.u32 (!%p1619_p3), %s1737_s3, 3  ;;  %s369_s6 = scalar_lea.sflag (!%p1619_p3), [#allocation6], %s1737_s3 }
  0x3f   : > { %s372_s20 = scalar_lea.vmem (!%p1619_p3), [#allocation5], %s1740_s4 }
  0x40   : > { %1485 = dma.done.wait (%p1664_p0), %s369_s6, 128  }
  0x41   : > { %1487 = vsyncadd (%p1664_p0), %s369_s6, 4294967168  ;;  %s378_s0 = sand.u32 1, %s1611_s30   ;;  %s382_s15 = scalar_lea.vmem [#allocation8], %s1740_s4 }
  0x42   : > { %s379_s11 = scalar_lea.sflag [#allocation9], %s378_s0 }
  0x43   : > { %1489 = dma.done.wait (%p1664_p0), %s379_s11, 256  }
  0x44   : > { %1491 = vsyncadd (%p1664_p0), %s379_s11, 4294967040  ;;  %s392_s21 = scalar_lea.vmem [#allocation10], %s1740_s4 }
  0x45   : > { %1493 = dma.done.wait (%p63_p1), [#allocation12], 1024  }
  0x46   : > { %1495 = vsyncadd (%p63_p1), [#allocation12], 4294966272 }
  0x47   : > { %1497 = dma.done.wait (%p63_p1), [#allocation15], 1024  }
  0x48   : > { %1499 = vsyncadd (%p63_p1), [#allocation15], 4294966272  ;;  %v463_v0 = vld [vmem:[#allocation13 + $0x18] sm:$0xff]  ;;  %v462_v1 = vld [vmem:[#allocation13 + $0x10] sm:$0xff]  ;;  %vm464_vm0 = vcmask 261120   ;;  %vm548_vm1 = vcmask 64512  }
  0x49   : > { %480 = vmatpush.msra.mxu0 %v463_v0  ;;  %v521_v2 = vld [vmem:[#allocation11 + $0x18] sm:$0xff]  ;;  %v461_v3 = vld [vmem:[#allocation13 + $0x8] sm:$0xff]  ;;  %v520_v4 = vld [vmem:[#allocation11 + $0x10] sm:$0xff]  ;;  %s1534_s30 = smov 104   ;;  %s1535_s12 = smov 112   ;;  %vm683_vm2 = vcmask 130112  }
  0x4a   : > { %538 = vmatpush.msra.mxu2 %v521_v2  ;;  %v519_v5 = vld [vmem:[#allocation11 + $0x8] sm:$0xff]  ;;  %v460_v6 = vld [vmem:[#allocation13] sm:$0xff]  ;;  %v517_v9 = vld [vmem:[%s372_s20] sm:$0xff]  ;;  %s1536_s10 = smov 120   ;;  %s1537_s19 = smov 16   ;;  %vm758_vm3 = vcmask 195712  }
  0x4b   : > { %481 = vmatpush.msra.mxu0 %v462_v1  ;;  %v458_v7 = vld [vmem:[%s382_s15] sm:$0xff]  ;;  %v492_v13 = vld [vmem:[#allocation14 + $0x18] sm:$0xff]  ;;  %v491_v22 = vld [vmem:[#allocation14 + $0x10] sm:$0xff]  ;;  %s1538_s17 = smov 8   ;;  %s1539_s5 = smov 24   ;;  %vm833_vm4 = vcmask 261312  }
  0x4c   : > { %539 = vmatpush.msra.mxu2 %v520_v4  ;;  %v518_v8 = vld [vmem:[#allocation11] sm:$0xff]  ;;  %508 = vmatpush.msra.mxu1 %v492_v13  ;;  %v490_v23 = vld [vmem:[#allocation14 + $0x8] sm:$0xff]  ;;  %v459_v25 = vld [vmem:[%s392_s21] sm:$0xff]  ;;  %s1082_s29 = sshll.u32 %s1518_s27, 3  ;;  %s453_s18 = scalar_lea.vmem [#allocation17], %s1740_s4 }
  0x4d   : > { %482 = vmatpush.msra.mxu0 %v461_v3  ;;  %v489_v24 = vld [vmem:[#allocation14] sm:$0xff]  ;;  %s876_s28 = scalar_lea.hbm %s1848_s7, %s1082_s29  ;;  %s878_s22 = sshll.u32 %s453_s18, 4  ;;  %s879_s22 = int_to_ptr.vmem [resolvable:$true] %s878_s22 }
  0x4e   : > { %540 = vmatpush.msra.mxu2 %v519_v5  ;;  %509 = vmatpush.msra.mxu1 %v491_v22  ;;  %s880_s23 = sshll.u32 %s876_s28, 4  ;;  %s865_s9 = scalar_lea.sflag [#allocation7], %s1737_s3  ;;  %s881_s23 = int_to_ptr.hbm [resolvable:$true] %s880_s23 }
  0x4f   : > { %483 = vmatpush.msra.mxu0 %v460_v6  ;;  %s1446_s14 = sshra.s32 %s881_s23, 4  ;;  %s1452_s0 = scalar_lea.hbm %s1848_s7, 16  ;;  %s1447_s14 = int_to_ptr.hbm [resolvable:$true] %s1446_s14 }
  0x50   : > { %1065 = vmatmul.msk.f32.vlgmr.msra.gmra.mxu0 %vm464_vm0, %v458_v7  ;;  %541 = vmatpush.msra.mxu2 %v518_v8  ;;  %s1448_s6 = scalar_lea.hbm %s1447_s14, 8  ;;  %p1453_p10 = scmp.lt.s32.totalorder %s1447_s14, %s1848_s7 }
  0x51   : > { %1067 = vmatmul.msk.f32.vlgmr.msra.gmra.mxu2 %vm464_vm0, %v517_v9  ;;  %510 = vmatpush.msra.mxu1 %v490_v23  ;;  %v839_v9 = vld [vmem:[#allocation16 + $0x18] sm:$0xff]  ;;  %p1449_p1 = scmp.ne.s32.totalorder %s1447_s14, %s1448_s6  ;;  %p1454_p11 = scmp.lt.s32.totalorder %s1452_s0, %s1448_s6 }
  0x53   : > { %511 = vmatpush.msra.mxu1 %v489_v24  ;;  %p1450_p3 = pnand %p1449_p1, %p1668_p2  ;;  %p1455_p12 = por %p1454_p11, %p1453_p10 }
  0x54   : > { %1066 = vmatmul.msk.f32.vlgmr.msra.gmra.mxu1 %vm464_vm0, %v459_v25 }
  0x55   : > { %p1451_p5 = pneg %p1450_p3 }
  0x57   : > { %p1456_p13 = pnand %p1455_p12, %p1451_p5 }
  0xcd   : > { %v485_v10 = vpop.f32.mrf.mxu0 }
  0xce   : > { %488 = vst.msk [vmem:[#allocation2] sm:$0xff] %vm464_vm0, %v485_v10  ;;  %v838_v10 = vld [vmem:[#allocation16 + $0x10] sm:$0xff] }
  0xd1   : > { %v513_v37 = vpop.f32.mrf.mxu1 }
  0xd2   : > { %516 = vst.msk [vmem:[#allocation3] sm:$0xff] %vm464_vm0, %v513_v37 }
  0xd4   : > { %v543_v12 = vpop.f32.mrf.mxu2 }
  0xd5   : > { %v760_v11 = vld [vmem:[#allocation2] sm:$0xff] }
  0xd6   : > { %765 = vrot.lane.b32.xlu2 %v760_v11, %s1534_s30  ;;  %690 = vrot.lane.b32.xlu0 %v760_v11, %s1535_s12 }
  0xd7   : > { %615 = vrot.lane.b32.xlu1 %v760_v11, %s1536_s10  ;;  %1068 = vmatpush.xpose.msk.msra.mxu3 %vm548_vm1, %v760_v11  ;;  %v837_v11 = vld [vmem:[#allocation16 + $0x8] sm:$0xff] }
  0xd9   : > { %v547_v38 = vld [vmem:[#allocation3] sm:$0xff] }
  0xda   : > { %1069 = vmatmul.msk.f32.vlgmr.msra.gmra.mxu3 %vm548_vm1, %v543_v12 }
  0xdb   : > { %604 = vmatpush.msrb.mxu3 %v547_v38 }
  0xde   : > { %762 = vrot.lane.b32.xlu2 %v543_v12, %s1534_s30  ;;  %687 = vrot.lane.b32.xlu0 %v543_v12, %s1535_s12 }
  0xdf   : > { %612 = vrot.lane.b32.xlu1 %v543_v12, %s1536_s10  ;;  %v836_v12 = vld [vmem:[#allocation16] sm:$0xff] }
 0x130   : > { %v766_v16 = vpop.permute.xlu2 %765 }
 0x138   : > { %v763_v19 = vpop.permute.xlu2 %762 }
 0x148   : > { %v691_v14 = vpop.permute.xlu0 %690 }
 0x149   : > { %v616_v15 = vpop.permute.xlu1 %615  ;;  %1074 = vmatpush.xpose.msk.msrb.mxu2 %vm548_vm1, %v691_v14 }
 0x14a   : > { %1071 = vmatpush.xpose.msk.msrb.mxu0 %vm548_vm1, %v616_v15 }
 0x14d   : > { %855 = vmatpush.msra.mxu2 %v839_v9 }
 0x14e   : > { %1077 = vmatpush.xpose.msk.msra.mxu0 %vm548_vm1, %v766_v16 }
 0x14f   : > { %856 = vmatpush.msra.mxu2 %v838_v10 }
 0x150   : > { %v688_v17 = vpop.permute.xlu0 %687 }
 0x151   : > { %v613_v18 = vpop.permute.xlu1 %612  ;;  %1075 = vmatmul.msk.f32.vlgmr.msrb.gmra.mxu2 %vm548_vm1, %v688_v17 }
 0x152   : > { %1072 = vmatmul.msk.f32.vlgmr.msrb.gmra.mxu0 %vm548_vm1, %v613_v18  ;;  %857 = vmatpush.msra.mxu2 %v837_v11 }
 0x154   : > { %858 = vmatpush.msra.mxu2 %v836_v12 }
 0x15a   : > { %1078 = vmatmul.msk.f32.vlgmr.msra.gmra.mxu0 %vm548_vm1, %v763_v19 }
 0x15d   : > { %v572_v20 = vpop.f32.mrf.mxu3 }
 0x15e   : > { %v575_v21 = vsel %vm548_vm1, %v572_v20, -inf }
 0x15f   : > { %576 = vmax.xlane.f32.xlu0 %v575_v21 }
 0x1cf   : > { %v638_v26 = vpop.f32.mrf.mxu0 }
 0x1d0   : > { %v641_v27 = vsel %vm548_vm1, %v638_v26, -inf }
 0x1d1   : > { %642 = vmax.xlane.f32.xlu1 %v641_v27 }
 0x1d2   : > { %v577_v28 = vpop.xlane.xlu0 %576 }
 0x1d3   : > { %v578_v29 = vsub.f32 %v572_v20, %v577_v28 }
 0x1d4   : > { %v713_v30 = vpop.f32.mrf.mxu2 }
 0x1d5   : > { %v579_v31 = vmul.f32 1.442695, %v578_v29  ;;  %v716_v32 = vsel %vm548_vm1, %v713_v30, -inf }
 0x1d6   : > { %717 = vmax.xlane.f32.xlu2 %v716_v32 }
 0x1d7   : > { %1206 = vpow2.f32 %v579_v31  ;;  %v788_v33 = vpop.f32.mrf.mxu0 }
 0x1d8   : > { %v791_v35 = vsel %vm548_vm1, %v788_v33, -inf }
 0x1dd   : > { %v1207_v34 = vpop.eup %1206 }
 0x1de   : > { %792 = vmax.xlane.f32.xlu2 %v791_v35  ;;  %v581_v36 = vsel %vm548_vm1, %v1207_v34, 0.0 }
 0x1df   : > { %582 = vadd.xlane.f32.xlu0 %v581_v36 }
 0x244   : > { %v643_v39 = vpop.xlane.xlu1 %642 }
 0x245   : > { %v644_v40 = vsub.f32 %v638_v26, %v643_v39 }
 0x247   : > { %v645_v41 = vmul.f32 1.442695, %v644_v40 }
 0x249   : > { %1208 = vpow2.f32 %v645_v41  ;;  %v718_v42 = vpop.xlane.xlu2 %717 }
 0x24a   : > { %v719_v43 = vsub.f32 %v713_v30, %v718_v42 }
 0x24c   : > { %v720_v44 = vmul.f32 1.442695, %v719_v43 }
 0x24e   : > { %1210 = vpow2.f32 %v720_v44 }
 0x24f   : > { %v1209_v45 = vpop.eup %1208 }
 0x250   : > { %v647_v46 = vsel %vm548_vm1, %v1209_v45, 0.0 }
 0x251   : > { %648 = vadd.xlane.f32.xlu1 %v647_v46  ;;  %v793_v47 = vpop.xlane.xlu2 %792 }
 0x252   : > { %v794_v48 = vsub.f32 %v788_v33, %v793_v47  ;;  %v583_v49 = vpop.xlane.xlu0 %582 }
 0x253   : > { %1212 = vrcp.f32 %v583_v49 }
 0x254   : > { %v1211_v50 = vpop.eup %1210  ;;  %v795_v51 = vmul.f32 1.442695, %v794_v48 }
 0x255   : > { %v722_v52 = vsel %vm548_vm1, %v1211_v50, 0.0 }
 0x256   : > { %1214 = vpow2.f32 %v795_v51  ;;  %723 = vadd.xlane.f32.xlu2 %v722_v52 }
 0x259   : > { %v1213_v53 = vpop.eup %1212 }
 0x25a   : > { %v585_v54 = vmul.f32 %v1213_v53, %v1207_v34 }
 0x25c   : > { %v1215_v55 = vpop.eup %1214  ;;  %1070 = vmatmul.msk.f32.vlgmr.msrb.gmra.mxu3 %vm548_vm1, %v585_v54 }
 0x25d   : > { %v797_v56 = vsel %vm548_vm1, %v1215_v55, 0.0 }
 0x25e   : > { %798 = vadd.xlane.f32.xlu0 %v797_v56 }
 0x26a   : > { %653 = vrot.lane.b32.xlu1 %v547_v38, %s1536_s10 }
 0x26e   : > { %728 = vrot.lane.b32.xlu2 %v547_v38, %s1535_s12 }
 0x272   : > { %803 = vrot.lane.b32.xlu0 %v547_v38, %s1534_s30 }
 0x2c4   : > { %v649_v59 = vpop.xlane.xlu1 %648 }
 0x2c9   : > { %v724_v57 = vpop.xlane.xlu2 %723 }
 0x2ca   : > { %1216 = vrcp.f32 %v724_v57 }
 0x2cb   : > { %1218 = vrcp.f32 %v649_v59 }
 0x2d0   : > { %v1217_v58 = vpop.eup %1216 }
 0x2d1   : > { %v726_v60 = vmul.f32 %v1217_v58, %v1211_v50  ;;  %v729_v61 = vpop.permute.xlu2 %728  ;;  %v799_v62 = vpop.xlane.xlu0 %798 }
 0x2d2   : > { %749 = vmatpush.msra.mxu3 %v729_v61  ;;  %v1219_v63 = vpop.eup %1218  ;;  %1220 = vrcp.f32 %v799_v62 }
 0x2d3   : > { %1076 = vmatmul.msk.f32.vlgmr.msra.gmra.mxu3 %vm548_vm1, %v726_v60  ;;  %v651_v1 = vmul.f32 %v1219_v63, %v1209_v45 }
 0x2d8   : > { %v1221_v3 = vpop.eup %1220 }
 0x2d9   : > { %v801_v4 = vmul.f32 %v1221_v3, %v1215_v55 }
 0x2dc   : > { %v654_v0 = vpop.permute.xlu1 %653 }
 0x2dd   : > { %674 = vmatpush.msrb.mxu1 %v654_v0 }
 0x2de   : > { %1073 = vmatmul.msk.f32.vlgmr.msrb.gmra.mxu1 %vm548_vm1, %v651_v1 }
 0x2df   : > { %v606_v2 = vpop.f32.mrf.mxu3 }
 0x2e0   : > { %609 = vst.msk [vmem:[#allocation4] sm:$0xff] %vm548_vm1, %v606_v2 }
 0x2e4   : > { %v804_v5 = vpop.permute.xlu0 %803 }
 0x2e5   : > { %824 = vmatpush.msra.mxu1 %v804_v5 }
 0x2e6   : > { %1079 = vmatmul.msk.f32.vlgmr.msra.gmra.mxu1 %vm548_vm1, %v801_v4 }
 0x356   : > { %v751_v6 = vpop.f32.mrf.mxu3 }
 0x357   : > { %755 = vrot.lane.b32.xlu0 %v751_v6, %s1537_s19 }
 0x35b   : > { %v676_v7 = vpop.f32.mrf.mxu1 }
 0x35c   : > { %680 = vrot.lane.b32.xlu1 %v676_v7, %s1538_s17 }
 0x363   : > { %v826_v8 = vpop.f32.mrf.mxu1 }
 0x364   : > { %830 = vrot.lane.b32.xlu2 %v826_v8, %s1539_s5 }
 0x3be   : > { %v831_v15 = vpop.permute.xlu2 %830 }
 0x3c9   : > { %v756_v14 = vpop.permute.xlu0 %755 }
 0x3ce   : > { %v681_v13 = vpop.permute.xlu1 %680 }
 0x3cf   : > { %684 = vst.msk [vmem:[#allocation4] sm:$0xff] %vm683_vm2, %v681_v13 }
 0x3d0   : > { %759 = vst.msk [vmem:[#allocation4] sm:$0xff] %vm758_vm3, %v756_v14 }
 0x3d1   : > { %834 = vst.msk [vmem:[#allocation4] sm:$0xff] %vm833_vm4, %v831_v15 }
 0x3d8   : > { %v835_v16 = vld [vmem:[#allocation4] sm:$0xff] }
 0x3d9   : > { %1080 = vmatmul.msk.f32.vlgmr.msra.gmra.mxu2 %vm464_vm0, %v835_v16 }
 0x45c   : > { %v860_v17 = vpop.f32.mrf.mxu2 }
 0x45d   : > { %863 = vst.msk [vmem:[%s453_s18] sm:$0xff] %vm464_vm0, %v860_v17 }
 0x45e   : > { %1459 = shalt.err (!%p1456_p13)
}
 0x45f   : > { %1107 = dma.vmem_to_hbm [thread:$0]  (%p1668_p2), %s879_s22, 128, %s881_s23, %s865_s9  }
 0x460 PF: > { %s1884_s3 = sld [smem:[#allocation24_spill]]  ;;  %s892_s15 = sand.u32 1, %s1506_s24  }
 0x461   : > { %p1133_p0 = pnand %p1049_p6, %p1675_p7  ;;  %s893_s21 = scalar_lea.sflag [#allocation7], %s892_s15 }
 0x463   : > { %p1134_p4 = pneg %p1133_p0 }
 0x465   : > { %1501 = dma.done.wait (%p1134_p4), %s893_s21, 128  }
 0x466   : > { %1503 = vsyncadd (%p1134_p4), %s893_s21, 4294967168  ;;  %s28_s29 = sadd.s32 1, %s1884_s3   ;;  %s1885_s30 = sld [smem:[#allocation26_spill]] }
 0x467   : > { %p25_p9 = scmp.ge.s32.totalorder %s28_s29, 4   ;;  %s1886_s27 = sld [smem:[#allocation23_spill]] }
 0x468   : > { %s1887_s28 = sld [smem:[#allocation25_spill]]  ;;  %s1888_s24 = smov %s1510_s25 }
 0x469   : > { %s1889_s25 = smov %s1514_s26  ;;  %27 = sbr.rel (!%p25_p9) target bundleno = 17 (0x11), region = 137 }
 0x46c   : > { %s1890_s26 = smov %s1885_s30 }
 0x46e   :  { %899 = vsyncpa [#allocation6], 1 }
 0x46f   :  { %901 = vsyncpa [#allocation6 + $0x1], 1 }
 0x470   :  { %902 = vsyncpa [#allocation9], 1 }
 0x471   :  { %904 = vsyncpa [#allocation9 + $0x1], 1 }
 0x472   :  { %905 = vsyncpa [#allocation12], 1 }
 0x473   :  { %906 = vsyncpa [#allocation15], 1 }
 0x474   :  { %907 = vsyncpa [#allocation7], 1 }
 0x475   :  { %909 = vsyncpa [#allocation7 + $0x1], 1 }

</bundles_post_ra>
